<compile_context>
chip_gen: v7x
topology: tpu7x:2x2x1
jax: 0.10.0
libtpu: 0.0.40
codegen_flags: <defaults>
</compile_context>

<pallas_src>
import math
import functools

import jax
import jax.numpy as jnp
from jax.experimental import pallas as pl
from jax.experimental.pallas import tpu as pltpu


NEG_SLOPE = 0.01  # nn.LeakyReLU() default


def _round_up(x, m):
    return ((x + m - 1) // m) * m


def _choose_batch_tile(batch):
    """Multiple-of-8 batch tile: 1 grid step when small, >=2 when large."""
    b8 = _round_up(batch, 8)
    if b8 < 1024:
        # Tiny/medium batch: a single grid step; splitting only adds the
        # ~0.35 us per-step overhead in an overhead-bound kernel.
        return b8
    # Large batch: at least 2 grid steps so the "parallel" batch axis can
    # shard across both v7x TensorCores; each tile stays >=512 rows
    # (>=85% of HBM roofline per tile sweep), capped at 2048.
    tile = min(2048, _round_up((b8 + 1) // 2, 8))
    # Shrink until batch-padding overshoot is <= ~5% (always succeeds by 8).
    while tile > 8 and _round_up(b8, tile) - b8 > max(8, b8 // 20):
        tile -= 8
    return tile


def pack_fcn_params(params, compute_dtype=jnp.float32):
    """Pack per-layer (W, b) into zero-padded stacks, ONCE, outside jit.

    Returns (w_stack (L, Dp, Dp) in compute_dtype, b_stack (L, 1, Dp) f32,
    out_dim).  Zero padding is exact: padded rows/cols/bias entries are 0 and
    LeakyReLU(0) = 0, so padded lanes stay 0 through every layer.
    """
    ws = [jnp.asarray(w, jnp.float32) for (w, _) in params]
    bs = [jnp.asarray(b, jnp.float32) for (_, b) in params]
    dims = [ws[0].shape[0]] + [w.shape[1] for w in ws]
    d_pad = _round_up(max(dims), 128)                       # lane-dense width
    w_stack = jnp.stack([
        jnp.pad(w, ((0, d_pad - w.shape[0]), (0, d_pad - w.shape[1])))
        for w in ws
    ]).astype(compute_dtype)                                # matmul operand dtype
    b_stack = jnp.stack([
        jnp.pad(b, (0, d_pad - b.shape[0]))[None, :]
        for b in bs
    ]).astype(jnp.float32)                                  # bias stays f32
    return w_stack, b_stack, dims[-1]


def _make_fcn_kernel(num_layers, in_dim, out_dim):
    """Fused kernel body: all Linear + LeakyReLU layers, activation on-chip.

    x_ref: (TM, in_dim)     -- batch tile of the input at its REAL width
    w_ref: (L, Dp, Dp)      -- padded weight stack, VMEM-resident
    b_ref: (L, 1, Dp)       -- padded bias stack (f32), VMEM-resident
    o_ref: (TM, out_dim)    -- output tile at its REAL width
    """
    def kernel(x_ref, w_ref, b_ref, o_ref):
        cdt = w_ref.dtype                      # compute dtype set by pre-cast
        d_pad = w_ref.shape[1]
        act = x_ref[...].astype(cdt)           # (TM, in_dim)
        k = in_dim
        y = None
        for l in range(num_layers):            # static unrolled layer loop
            # Layer 0 contracts over the real in_dim (skips the zero-padded
            # weight rows); later layers use the full padded width -- the
            # padded lanes of `act` are exactly 0 there.
            y = jnp.dot(act, w_ref[l, :k, :],
                        preferred_element_type=jnp.float32)
            y = y + b_ref[l]                    # (1, Dp) broadcasts, f32
            y = jnp.maximum(y, NEG_SLOPE * y)   # LeakyReLU: single vmax (f32)
            act = y.astype(cdt)
            k = d_pad
        o_ref[...] = y[:, :out_dim].astype(o_ref.dtype)
    return kernel


def fcn_forward(w_stack, b_stack, x, out_dim, *, batch_tile=None):
    """FCN.forward with pre-packed params; one fused pallas_call."""
    num_layers, d_pad, _ = w_stack.shape
    batch, in_dim = x.shape
    assert in_dim <= d_pad

    if batch_tile is None:
        batch_tile = _choose_batch_tile(batch)
    batch_tile = max(8, _round_up(batch_tile, 8))
    b_pad = _round_up(max(batch, batch_tile), batch_tile)

    # Only batch rows are padded (when needed); feature dims stay real-width.
    x_in = x if b_pad == batch else jnp.pad(x, ((0, b_pad - batch), (0, 0)))

    grid = (b_pad // batch_tile,)

    out = pl.pallas_call(
        _make_fcn_kernel(num_layers, in_dim, out_dim),
        out_shape=jax.ShapeDtypeStruct((b_pad, out_dim), x.dtype),
        grid=grid,
        in_specs=[
            # Activation: tiled along batch, pipelined / double-buffered.
            # Last dim == full array dim (real in_dim) -> legal block shape.
            pl.BlockSpec((batch_tile, in_dim), lambda i: (i, 0)),
            # Weights / biases: constant block -> fetched once, VMEM-resident.
            pl.BlockSpec((num_layers, d_pad, d_pad), lambda i: (0, 0, 0)),
            pl.BlockSpec((num_layers, 1, d_pad), lambda i: (0, 0, 0)),
        ],
        # Output at its real width (last dim == full array dim).
        out_specs=pl.BlockSpec((batch_tile, out_dim), lambda i: (i, 0)),
        compiler_params=pltpu.CompilerParams(
            dimension_semantics=("parallel",)),
    )(x_in, w_stack, b_stack)

    return out if b_pad == batch else out[:batch]


def init_fcn_params(key, n_dim):
    """Deterministic parameters mimicking nn.Linear default init
    (uniform in [-1/sqrt(in_dim), 1/sqrt(in_dim)]), stored as (in, out)."""
    params = []
    for i in range(len(n_dim) - 1):
        in_dim, out_dim = n_dim[i], n_dim[i + 1]
        key, kw, kb = jax.random.split(key, 3)
        bound = 1.0 / math.sqrt(in_dim)
        w = jax.random.uniform(kw, (in_dim, out_dim), jnp.float32, -bound, bound)
        b = jax.random.uniform(kb, (out_dim,), jnp.float32, -bound, bound)
        params.append((w, b))
    return params


def fcn_forward_ref(params, x):
    """Pure-JAX reference (matches PyTorch FCN.forward)."""
    for w, b in params:
        y = x @ w + b
        x = jnp.where(y > 0, y, NEG_SLOPE * y)
    return x


# TODO(synk): forward_features() (per-layer feature concatenation) is not
# implemented; only forward() is, per the spec's forward pass.


if __name__ == "__main__":
    key = jax.random.PRNGKey(0)
    n_dim = [32, 64, 48, 16]   # FCN(n_dim) -> 3 (Linear + LeakyReLU) layers
    batch = 8

    kx, kp = jax.random.split(key)
    x = jax.random.normal(kx, (batch, n_dim[0]), jnp.float32)
    params = init_fcn_params(kp, n_dim)

    # Pack / pad weights once at init (outside the jitted forward).
    # For v6e/v7x (and v5e matmul-only) bf16 path, pass
    # compute_dtype=jnp.bfloat16 here; default f32 keeps the self-test exact.
    w_stack, b_stack, out_dim = pack_fcn_params(params, jnp.float32)

    fwd = jax.jit(functools.partial(fcn_forward, out_dim=out_dim))
    out = jax.block_until_ready(fwd(w_stack, b_stack, x))

    ref = fcn_forward_ref(params, x)
    assert out.shape == (batch, n_dim[-1])
    assert jnp.allclose(out, ref, atol=2e-5, rtol=2e-5), "mismatch vs reference"

    print("KERNEL_OK")
</pallas_src>

<mosaic_0001>
module attributes {stable_mosaic.version = 11 : i64} {
  func.func @kernel(%arg0: i32, %arg1: memref<8x32xf32, #tpu.memory_space<vmem>>, %arg2: memref<3x128x128xf32, #tpu.memory_space<vmem>>, %arg3: memref<3x1x128xf32, #tpu.memory_space<vmem>>, %arg4: memref<8x16xf32, #tpu.memory_space<vmem>>) attributes {dimension_semantics = [#tpu.dimension_semantics<parallel>], iteration_bounds = array<i64: 1>, scalar_prefetch = 0 : i64, scratch_operands = 0 : i64, tpu.core_type = #tpu.core_type<tc>, window_params = [{transform_indices = @transform_0, window_bounds = array<i64: 8, 32>}, {pipeline_mode = #tpu.pipeline_mode<synchronous>, transform_indices = @transform_1, window_bounds = array<i64: 3, 128, 128>}, {pipeline_mode = #tpu.pipeline_mode<synchronous>, transform_indices = @transform_2, window_bounds = array<i64: 3, 1, 128>}, {transform_indices = @transform_3, window_bounds = array<i64: 8, 16>}]} {
    %c0 = arith.constant 0 : index
    %c0_0 = arith.constant 0 : index
    %0 = vector.load %arg1[%c0, %c0_0] : memref<8x32xf32, #tpu.memory_space<vmem>>, vector<8x32xf32>
    %c0_1 = arith.constant 0 : index
    %c0_2 = arith.constant 0 : index
    %c0_3 = arith.constant 0 : index
    %1 = vector.load %arg2[%c0_1, %c0_2, %c0_3] : memref<3x128x128xf32, #tpu.memory_space<vmem>>, vector<1x32x128xf32>
    %2 = vector.shape_cast %1 : vector<1x32x128xf32> to vector<32x128xf32>
    %cst = arith.constant dense<0.000000e+00> : vector<8x128xf32>
    %3 = tpu.matmul %0, %2, %cst {dimension_numbers = #tpu.dot_dimension_numbers<[1], [0], [0], [1], [0, 0, 1, 1], [], []>} : vector<8x32xf32>, vector<32x128xf32>, vector<8x128xf32> -> vector<8x128xf32>
    %c0_4 = arith.constant 0 : index
    %c0_5 = arith.constant 0 : index
    %c0_6 = arith.constant 0 : index
    %4 = vector.load %arg3[%c0_4, %c0_5, %c0_6] : memref<3x1x128xf32, #tpu.memory_space<vmem>>, vector<1x1x128xf32>
    %5 = vector.shape_cast %4 : vector<1x1x128xf32> to vector<1x128xf32>
    %6 = vector.broadcast %5 : vector<1x128xf32> to vector<8x128xf32>
    %7 = arith.addf %3, %6 : vector<8x128xf32>
    %cst_7 = arith.constant 0.00999999977 : f32
    %8 = vector.broadcast %cst_7 : f32 to vector<8x128xf32>
    %9 = arith.mulf %8, %7 : vector<8x128xf32>
    %10 = arith.maximumf %7, %9 : vector<8x128xf32>
    %c1 = arith.constant 1 : index
    %c0_8 = arith.constant 0 : index
    %c0_9 = arith.constant 0 : index
    %11 = vector.load %arg2[%c1, %c0_8, %c0_9] : memref<3x128x128xf32, #tpu.memory_space<vmem>>, vector<1x128x128xf32>
    %12 = vector.shape_cast %11 : vector<1x128x128xf32> to vector<128x128xf32>
    %cst_10 = arith.constant dense<0.000000e+00> : vector<8x128xf32>
    %13 = tpu.matmul %10, %12, %cst_10 {dimension_numbers = #tpu.dot_dimension_numbers<[1], [0], [0], [1], [0, 0, 1, 1], [], []>} : vector<8x128xf32>, vector<128x128xf32>, vector<8x128xf32> -> vector<8x128xf32>
    %c1_11 = arith.constant 1 : index
    %c0_12 = arith.constant 0 : index
    %c0_13 = arith.constant 0 : index
    %14 = vector.load %arg3[%c1_11, %c0_12, %c0_13] : memref<3x1x128xf32, #tpu.memory_space<vmem>>, vector<1x1x128xf32>
    %15 = vector.shape_cast %14 : vector<1x1x128xf32> to vector<1x128xf32>
    %16 = vector.broadcast %15 : vector<1x128xf32> to vector<8x128xf32>
    %17 = arith.addf %13, %16 : vector<8x128xf32>
    %cst_14 = arith.constant 0.00999999977 : f32
    %18 = vector.broadcast %cst_14 : f32 to vector<8x128xf32>
    %19 = arith.mulf %18, %17 : vector<8x128xf32>
    %20 = arith.maximumf %17, %19 : vector<8x128xf32>
    %c2 = arith.constant 2 : index
    %c0_15 = arith.constant 0 : index
    %c0_16 = arith.constant 0 : index
    %21 = vector.load %arg2[%c2, %c0_15, %c0_16] : memref<3x128x128xf32, #tpu.memory_space<vmem>>, vector<1x128x128xf32>
    %22 = vector.shape_cast %21 : vector<1x128x128xf32> to vector<128x128xf32>
    %cst_17 = arith.constant dense<0.000000e+00> : vector<8x128xf32>
    %23 = tpu.matmul %20, %22, %cst_17 {dimension_numbers = #tpu.dot_dimension_numbers<[1], [0], [0], [1], [0, 0, 1, 1], [], []>} : vector<8x128xf32>, vector<128x128xf32>, vector<8x128xf32> -> vector<8x128xf32>
    %c2_18 = arith.constant 2 : index
    %c0_19 = arith.constant 0 : index
    %c0_20 = arith.constant 0 : index
    %24 = vector.load %arg3[%c2_18, %c0_19, %c0_20] : memref<3x1x128xf32, #tpu.memory_space<vmem>>, vector<1x1x128xf32>
    %25 = vector.shape_cast %24 : vector<1x1x128xf32> to vector<1x128xf32>
    %26 = vector.broadcast %25 : vector<1x128xf32> to vector<8x128xf32>
    %27 = arith.addf %23, %26 : vector<8x128xf32>
    %cst_21 = arith.constant 0.00999999977 : f32
    %28 = vector.broadcast %cst_21 : f32 to vector<8x128xf32>
    %29 = arith.mulf %28, %27 : vector<8x128xf32>
    %30 = arith.maximumf %27, %29 : vector<8x128xf32>
    %31 = vector.extract_strided_slice %30 {offsets = [0, 0], sizes = [8, 16], strides = [1, 1]} : vector<8x128xf32> to vector<8x16xf32>
    %c0_22 = arith.constant 0 : index
    %c0_23 = arith.constant 0 : index
    %32 = vector.load %arg4[%c0_22, %c0_23] : memref<8x16xf32, #tpu.memory_space<vmem>>, vector<8x16xf32>
    tpu.vector_store %arg4[%c0_22, %c0_23], %31 {strides = array<i32>} : memref<8x16xf32, #tpu.memory_space<vmem>>, vector<8x16xf32>,
    return
  }
  func.func @transform_0(%arg0: i32) -> (i32, i32) {
    %c0_i32 = arith.constant 0 : i32
    %c0_i32_0 = arith.constant 0 : i32
    return %arg0, %c0_i32 : i32, i32
  }
  func.func @transform_1(%arg0: i32) -> (i32, i32, i32) {
    %c0_i32 = arith.constant 0 : i32
    %c0_i32_0 = arith.constant 0 : i32
    %c0_i32_1 = arith.constant 0 : i32
    %c0_i32_2 = arith.constant 0 : i32
    return %c0_i32, %c0_i32_0, %c0_i32_1 : i32, i32, i32
  }
  func.func @transform_2(%arg0: i32) -> (i32, i32, i32) {
    %c0_i32 = arith.constant 0 : i32
    %c0_i32_0 = arith.constant 0 : i32
    %c0_i32_1 = arith.constant 0 : i32
    %c0_i32_2 = arith.constant 0 : i32
    return %c0_i32, %c0_i32_0, %c0_i32_1 : i32, i32, i32
  }
  func.func @transform_3(%arg0: i32) -> (i32, i32) {
    %c0_i32 = arith.constant 0 : i32
    %c0_i32_0 = arith.constant 0 : i32
    return %arg0, %c0_i32 : i32, i32
  }
}

</mosaic_0001>

<bundles_post_ra>
// kernel: fcn_forward.1
= control target key start
LH: loop header
LB: loop body
LE: loop exit
PB: predicated region body
PF: predicated region fallthrough
CT: control target
= control target key end

     0   :  { %8 = vsyncpa [#allocation3], 0  ;;  %s702_s0 = inlined_call_operand.hbm [shape: f32[8,32], index: 0, kind: input, shape index: {}]   ;;  %s703_s1 = inlined_call_operand.hbm [shape: f32[3,128,128], index: 1, kind: input, shape index: {}]   ;;  %s704_s2 = inlined_call_operand.vmem [shape: f32[3,1,128], index: 2, kind: input, shape index: {}]   ;;  %s705_s3 = inlined_call_operand.hbm [shape: f32[8,16], index: 3, kind: output, shape index: {}]  }
   0x1   :  { %9 = vsyncpa [#allocation6], 0 }
   0x2   :  { %10 = vsyncpa [#allocation4], 0  ;;  %s601_s12 = smov [#allocation2]   ;;  %s602_s14 = smov [#allocation5]  }
   0x3   :  { %s17_s13 = sshll.u32 %s601_s12, 4  ;;  %s26_s15 = sshll.u32 %s602_s14, 4  ;;  %s18_s13 = int_to_ptr.vmem [resolvable:$true] %s17_s13  ;;  %s629_s15 = int_to_ptr.vmem [resolvable:$true] %s26_s15 }
   0x4   :  { %s529_s18 = scalar_lea.hbm %s702_s0, 128 }
   0x5   :  { %p530_p0 = scmp.ne.s32.totalorder %s702_s0, %s529_s18  ;;  %p533_p1 = scmp.lt.u32.totalorder %s529_s18, %s702_s0 }
   0x7   :  { %p535_p2 = pnand %p533_p1, %p530_p0 }
   0x9   :  { %538 = shalt.err (!%p535_p2)
}
   0xa   :  { %s539_s23 = scalar_lea.vmem %s18_s13, 128  ;;  %p544_p4 = scmp.lt.s32.totalorder %s18_s13, %s18_s13 }
   0xb   :  { %p540_p3 = scmp.ne.s32.totalorder %s18_s13, %s539_s23  ;;  %p545_p5 = scmp.lt.s32.totalorder %s539_s23, %s539_s23 }
   0xd   :  { %p546_p6 = por %p545_p5, %p544_p4 }
   0xf   :  { %p547_p7 = pnand %p546_p6, %p540_p3 }
  0x11   :  { %550 = shalt.err (!%p547_p7)
}
  0x12   :  { %20 = dma.hbm_to_vmem [thread:$0]  %s702_s0, 128, %s18_s13, [#allocation3]  }
  0x13   :  { %s551_s28 = scalar_lea.hbm %s703_s1, 6144 }
  0x14   :  { %p552_p8 = scmp.ne.s32.totalorder %s703_s1, %s551_s28  ;;  %p555_p9 = scmp.lt.u32.totalorder %s551_s28, %s703_s1 }
  0x16   :  { %p557_p10 = pnand %p555_p9, %p552_p8 }
  0x18   :  { %560 = shalt.err (!%p557_p10)
}
  0x19   :  { %s561_s6 = scalar_lea.vmem %s629_s15, 6144  ;;  %p566_p12 = scmp.lt.s32.totalorder %s629_s15, %s629_s15 }
  0x1a   :  { %p562_p11 = scmp.ne.s32.totalorder %s629_s15, %s561_s6  ;;  %p567_p13 = scmp.lt.s32.totalorder %s561_s6, %s561_s6 }
  0x1c   :  { %p568_p0 = por %p567_p13, %p566_p12 }
  0x1e   :  { %p569_p1 = pnand %p568_p0, %p562_p11 }
  0x20   :  { %572 = shalt.err (!%p569_p1)
}
  0x21   :  { %s603_s0 = smov 128   ;;  %s604_s7 = smov 8  }
  0x22   :  { %32 = dma.hbm_to_vmem [thread:$0]  %s703_s1, 6144, %s629_s15, [#allocation6], %s603_s0, %s603_s0, %s604_s7  }
  0x23   :  { %595 = dma.done.wait [#allocation3], 128  }
  0x24   :  { %596 = vsyncadd [#allocation3], 4294967168 }
  0x25   :  { %597 = dma.done.wait [#allocation6], 6144  }
  0x26   :  { %598 = vsyncadd [#allocation6], 4294961152  ;;  %v605_v0 = vmov 0.0|0.0   ;;  %vm606_vm0 = vmmov 0   ;;  %v607_v1 = vmov 0.0   ;;  %v42_v2 = vld [vmem:[#allocation5] sm:$0xff] }
  0x27   :  { %467 = vmatprep.subr.bf16.mxu0 %v605_v0  ;;  %394 = vmatprep.mubr.msk.f32.mxu0 %vm606_vm0, %v607_v1  ;;  %v43_v3 = vld [vmem:[#allocation5 + $0x8] sm:$0xff]  ;;  %v44_v4 = vld [vmem:[#allocation5 + $0x10] sm:$0xff]  ;;  %v45_v6 = vld [vmem:[#allocation5 + $0x18] sm:$0xff]  ;;  %vm53_vm1 = vcmask 261120   ;;  %s608_s15 = smov [#allocation7]   ;;  %vm323_vm2 = vcmask 130048  }
  0x28   :  { %473 = vmatprep.subr.bf16.mxu1 %v605_v0  ;;  %429 = vmatprep.mubr.msk.f32.mxu1 %vm606_vm0, %v607_v1  ;;  %v468_v5 = vpack.c.bf16 %v43_v3, %v42_v2  ;;  %v130_v7 = vld [vmem:[#allocation5 + $0x80] sm:$0xff]  ;;  %v131_v8 = vld [vmem:[#allocation5 + $0x88] sm:$0xff]  ;;  %v132_v9 = vld [vmem:[#allocation5 + $0x90] sm:$0xff]  ;;  %v471_v11 = vpack.c.bf16 %v45_v6, %v44_v4  ;;  %s331_s16 = sshll.u32 %s608_s15, 4  ;;  %s332_s16 = int_to_ptr.vmem [resolvable:$true] %s331_s16 }
  0x29   :  { %v133_v10 = vld [vmem:[#allocation5 + $0x98] sm:$0xff]  ;;  %v474_v12 = vpack.c.bf16 %v131_v8, %v130_v7  ;;  %v134_v14 = vld [vmem:[#allocation5 + $0xa0] sm:$0xff]  ;;  %v135_v15 = vld [vmem:[#allocation5 + $0xa8] sm:$0xff]  ;;  %s573_s17 = scalar_lea.vmem %s332_s16, 128  ;;  %p578_p3 = scmp.lt.s32.totalorder %s332_s16, %s332_s16 }
  0x2a   :  { %469 = vmatpush3.bf16.msra.mxu0 %v468_v5  ;;  %v477_v13 = vpack.c.bf16 %v133_v10, %v132_v9  ;;  %v41_v16 = vld [vmem:[#allocation2] sm:$0xff]  ;;  %v480_v17 = vpack.c.bf16 %v135_v15, %v134_v14  ;;  %v136_v18 = vld [vmem:[#allocation5 + $0xb0] sm:$0xff]  ;;  %v138_v21 = vld [vmem:[#allocation5 + $0xc0] sm:$0xff]  ;;  %p574_p2 = scmp.ne.s32.totalorder %s332_s16, %s573_s17  ;;  %p579_p4 = scmp.lt.s32.totalorder %s573_s17, %s573_s17 }
  0x2b   :  { %470 = vmatprep.subr.bf16.mxu0 %v605_v0  ;;  %475 = vmatpush3.bf16.msra.mxu1 %v474_v12  ;;  %v137_v19 = vld [vmem:[#allocation5 + $0xb8] sm:$0xff]  ;;  %v139_v22 = vld [vmem:[#allocation5 + $0xc8] sm:$0xff]  ;;  %v140_v24 = vld [vmem:[#allocation5 + $0xd0] sm:$0xff] }
  0x2c   :  { %476 = vmatprep.subr.bf16.mxu1 %v605_v0  ;;  %v483_v20 = vpack.c.bf16 %v137_v19, %v136_v18  ;;  %v486_v23 = vpack.c.bf16 %v139_v22, %v138_v21  ;;  %v141_v25 = vld [vmem:[#allocation5 + $0xd8] sm:$0xff]  ;;  %v142_v27 = vld [vmem:[#allocation5 + $0xe0] sm:$0xff]  ;;  %v143_v28 = vld [vmem:[#allocation5 + $0xe8] sm:$0xff]  ;;  %p580_p5 = por %p579_p4, %p578_p3 }
  0x2d   :  { %v489_v26 = vpack.c.bf16 %v141_v25, %v140_v24  ;;  %v492_v29 = vpack.c.bf16 %v143_v28, %v142_v27  ;;  %v144_v30 = vld [vmem:[#allocation5 + $0xf0] sm:$0xff]  ;;  %v145_v31 = vld [vmem:[#allocation5 + $0xf8] sm:$0xff]  ;;  %v227_v33 = vld [vmem:[#allocation5 + $0x100] sm:$0xff] }
  0x2e   :  { %472 = vmatpush3.bf16.msra.mxu0 %v471_v11  ;;  %v495_v32 = vpack.c.bf16 %v145_v31, %v144_v30  ;;  %v228_v34 = vld [vmem:[#allocation5 + $0x108] sm:$0xff]  ;;  %v229_v35 = vld [vmem:[#allocation5 + $0x110] sm:$0xff]  ;;  %v230_v37 = vld [vmem:[#allocation5 + $0x118] sm:$0xff]  ;;  %p581_p6 = pnand %p580_p5, %p574_p2 }
  0x2f   :  { %497 = vmatprep.subr.bf16.mxu0 %v605_v0  ;;  %478 = vmatpush3.bf16.msra.mxu1 %v477_v13  ;;  %v498_v36 = vpack.c.bf16 %v228_v34, %v227_v33  ;;  %v501_v38 = vpack.c.bf16 %v230_v37, %v229_v35  ;;  %v231_v39 = vld [vmem:[#allocation5 + $0x120] sm:$0xff]  ;;  %v232_v40 = vld [vmem:[#allocation5 + $0x128] sm:$0xff]  ;;  %v233_v42 = vld [vmem:[#allocation5 + $0x130] sm:$0xff] }
  0x30   :  { %479 = vmatprep.subr.bf16.mxu1 %v605_v0  ;;  %v504_v41 = vpack.c.bf16 %v232_v40, %v231_v39  ;;  %v234_v43 = vld [vmem:[#allocation5 + $0x138] sm:$0xff]  ;;  %v235_v45 = vld [vmem:[#allocation5 + $0x140] sm:$0xff]  ;;  %v236_v46 = vld [vmem:[#allocation5 + $0x148] sm:$0xff] }
  0x31   :  { %395 = vmatmul.mubr.msk.f32.vlgmr.msra.gmra.mrb[0].mxu0 %vm53_vm1, %v41_v16  ;;  %v507_v44 = vpack.c.bf16 %v234_v43, %v233_v42  ;;  %v510_v47 = vpack.c.bf16 %v236_v46, %v235_v45  ;;  %v237_v48 = vld [vmem:[#allocation5 + $0x150] sm:$0xff]  ;;  %v238_v49 = vld [vmem:[#allocation5 + $0x158] sm:$0xff]  ;;  %v239_v57 = vld [vmem:[#allocation5 + $0x160] sm:$0xff] }
  0x32   :  { %464 = vmatprep.mubr.msk.f32.mxu0 %vm606_vm0, %v607_v1  ;;  %499 = vmatpush3.bf16.msra.mxu0 %v498_v36  ;;  %v513_v50 = vpack.c.bf16 %v238_v49, %v237_v48  ;;  %v341_v51 = vld [vmem:[%s704_s2] ss:$0 sm:$0xff]  ;;  %v240_v58 = vld [vmem:[#allocation5 + $0x168] sm:$0xff]  ;;  %v241_v60 = vld [vmem:[#allocation5 + $0x170] sm:$0xff] }
  0x33   :  { %481 = vmatpush3.bf16.msra.mxu1 %v480_v17  ;;  %500 = vmatprep.subr.bf16.mxu0 %v605_v0  ;;  %v516_v59 = vpack.c.bf16 %v240_v58, %v239_v57  ;;  %v242_v61 = vld [vmem:[#allocation5 + $0x178] sm:$0xff] }
  0x34   :  { %482 = vmatprep.subr.bf16.mxu1 %v605_v0  ;;  %v519_v62 = vpack.c.bf16 %v242_v61, %v241_v60  ;;  %v344_v63 = vld [vmem:[%s704_s2 + $0x1] ss:$0 sm:$0xff]  ;;  %v346_v6 = vld [vmem:[%s704_s2 + $0x2] ss:$0 sm:$0xff] }
  0x36   :  { %502 = vmatpush3.bf16.msra.mxu0 %v501_v38 }
  0x37   :  { %484 = vmatpush3.bf16.msra.mxu1 %v483_v20  ;;  %503 = vmatprep.subr.bf16.mxu0 %v605_v0 }
  0x38   :  { %485 = vmatprep.subr.bf16.mxu1 %v605_v0 }
  0x3a   :  { %505 = vmatpush3.bf16.msra.mxu0 %v504_v41 }
  0x3b   :  { %487 = vmatpush3.bf16.msra.mxu1 %v486_v23  ;;  %506 = vmatprep.subr.bf16.mxu0 %v605_v0 }
  0x3c   :  { %488 = vmatprep.subr.bf16.mxu1 %v605_v0 }
  0x3e   :  { %508 = vmatpush3.bf16.msra.mxu0 %v507_v44 }
  0x3f   :  { %490 = vmatpush3.bf16.msra.mxu1 %v489_v26  ;;  %509 = vmatprep.subr.bf16.mxu0 %v605_v0 }
  0x40   :  { %491 = vmatprep.subr.bf16.mxu1 %v605_v0 }
  0x42   :  { %511 = vmatpush3.bf16.msra.mxu0 %v510_v47 }
  0x43   :  { %493 = vmatpush3.bf16.msra.mxu1 %v492_v29  ;;  %512 = vmatprep.subr.bf16.mxu0 %v605_v0 }
  0x44   :  { %494 = vmatprep.subr.bf16.mxu1 %v605_v0 }
  0x46   :  { %514 = vmatpush3.bf16.msra.mxu0 %v513_v50 }
  0x47   :  { %496 = vmatpush3.bf16.msra.mxu1 %v495_v32  ;;  %515 = vmatprep.subr.bf16.mxu0 %v605_v0 }
  0x4a   :  { %517 = vmatpush3.bf16.msra.mxu0 %v516_v59 }
  0x4b   :  { %518 = vmatprep.subr.bf16.mxu0 %v605_v0 }
  0x4e   :  { %520 = vmatpush3.bf16.msra.mxu0 %v519_v62 }
 0x104   :  { %v123_v52 = vpop.f32.mrb[0].mxu0 }
 0x105   :  { %v124_v53 = vadd.f32 %v341_v51, %v123_v52  ;;  %v396_v54 = vpop.f32.mrb[1].mxu0 }
 0x107   :  { %v127_v55 = vmul.f32 0.01, %v124_v53 }
 0x109   :  { %v128_v56 = vmax.f32 %v124_v53, %v127_v55 }
 0x10b   :  { %430 = vmatmul.mubr.f32.vlgmr.msra.gmra.mrb[0].mxu1 %v128_v56 }
 0x1de   :  { %v220_v1 = vpop.f32.mrb[0].mxu1 }
 0x1df   :  { %v221_v2 = vadd.f32 %v344_v63, %v220_v1  ;;  %v431_v3 = vpop.f32.mrb[1].mxu1 }
 0x1e1   :  { %v224_v4 = vmul.f32 0.01, %v221_v2 }
 0x1e3   :  { %v225_v5 = vmax.f32 %v221_v2, %v224_v4 }
 0x1e5   :  { %465 = vmatmul.mubr.f32.vlgmr.msra.gmra.mrb[2].mxu0 %v225_v5 }
 0x2b8   :  { %v317_v7 = vpop.f32.mrb[2].mxu0 }
 0x2b9   :  { %v318_v0 = vadd.f32 %v346_v6, %v317_v7  ;;  %v466_v8 = vpop.f32.mrb[3].mxu0 }
 0x2bb   :  { %v321_v9 = vmul.f32 0.01, %v318_v0 }
 0x2bd   :  { %v322_v10 = vmax.f32 %v318_v0, %v321_v9 }
 0x2bf   :  { %324 = vst.msk [vmem:[#allocation7] sm:$0xff] %vm323_vm2, %v322_v10 }
 0x2c0   :  { %584 = shalt.err (!%p581_p6)
}
 0x2c1   :  { %s585_s2 = scalar_lea.hbm %s705_s3, 128 }
 0x2c2   :  { %p586_p7 = scmp.ne.s32.totalorder %s705_s3, %s585_s2  ;;  %p589_p8 = scmp.lt.u32.totalorder %s585_s2, %s705_s3 }
 0x2c4   :  { %p591_p9 = pnand %p589_p8, %p586_p7 }
 0x2c6   :  { %594 = shalt.err (!%p591_p9)
}
 0x2c7   :  { %334 = dma.vmem_to_hbm [thread:$0]  %s332_s16, 128, %s705_s3, [#allocation4]  }
 0x2c8   :  { %599 = dma.done.wait [#allocation4], 128  }
 0x2c9   :  { %600 = vsyncadd [#allocation4], 4294967168 }
 0x2ca   :  { %338 = vsyncpa [#allocation3], 1 }
 0x2cb   :  { %339 = vsyncpa [#allocation6], 1 }
 0x2cc   :  { %340 = vsyncpa [#allocation4], 1 }

</bundles_post_ra>
